<compile_context>
chip_gen: v7x
topology: tpu7x:2x2x1
jax: 0.10.0
libtpu: 0.0.40
codegen_flags: <defaults>
</compile_context>

<pallas_src>
import jax
import jax.numpy as jnp
import numpy as np
from jax.experimental import pallas as pl
from jax.experimental.pallas import tpu as pltpu

NUM_CLASSES = 21
ALPHA = 2.0   # fixed exponent -> x * x
BETA = 4.0    # fixed exponent -> (x*x) * (x*x)
_LOG_EPS = float(np.log(1e-8))  # log of the torch.clamp(..., min=1e-8) floor


# --------------------------------------------------------------------------- #
# Kernel
# --------------------------------------------------------------------------- #
def _focal_loss_kernel(mask_ref, cls_t_ref, cls_p_ref, reg_t_ref, reg_p_ref,
                       cls_sum_ref, reg_sum_ref, cls_acc, reg_acc):
    t = pl.program_id(1)
    nt = pl.num_programs(1)

    @pl.when(t == 0)
    def _():
        cls_acc[...] = jnp.zeros_like(cls_acc)
        reg_acc[...] = jnp.zeros_like(reg_acc)

    mask = mask_ref[...].astype(jnp.float32)          # (B, 1, T), broadcasts
    one_m_mask = 1.0 - mask

    x = cls_p_ref[...].astype(jnp.float32)            # (B, C, T)
    y_true = cls_t_ref[...].astype(jnp.float32)       # (B, C, T)

    # sigmoid / log_sigmoid / log(1-sigmoid) from a single shared exp:
    #   e = exp(-|x|)
    #   log(sigmoid(x))     = min(x, 0) - log1p(e)
    #   sigmoid(x)          = where(x >= 0, 1/(1+e), e/(1+e))
    #   log(1 - sigmoid(x)) = min(-x, 0) - log1p(e), clamped at log(1e-8)
    e = jnp.exp(-jnp.abs(x))
    log1pe = jnp.log1p(e)
    inv = 1.0 / (1.0 + e)
    y_sig = jnp.where(x >= 0.0, inv, e * inv)
    y_log_sig = jnp.minimum(x, 0.0) - log1pe
    neg_log_sig = jnp.maximum(jnp.minimum(-x, 0.0) - log1pe, _LOG_EPS)

    # pow(., 2) / pow(., 4) as plain multiplies (VALU), not exp/log (EUP).
    one_m_sig = 1.0 - y_sig
    positive_loss = mask * (one_m_sig * one_m_sig) * y_log_sig
    om_true = 1.0 - y_true
    om_true2 = om_true * om_true
    negative_loss = (one_m_mask * (om_true2 * om_true2)
                     * (y_sig * y_sig) * neg_log_sig)
    cls_loss = positive_loss + negative_loss                        # (B, C, T)

    r_diff = (reg_t_ref[...].astype(jnp.float32)
              - reg_p_ref[...].astype(jnp.float32))                 # (B, 4, T)
    reg_loss = mask * (r_diff * r_diff)

    # Lane-resident partial sums: no per-step cross-lane reduce, no SMEM RMW.
    cls_acc[...] += jnp.sum(cls_loss, axis=(0, 1), keepdims=True)   # (1, 1, T)
    reg_acc[...] += jnp.sum(reg_loss, axis=(0, 1), keepdims=True)

    # Single cross-lane reduction + SMEM store per partition.
    @pl.when(t == nt - 1)
    def _():
        cls_sum_ref[0, 0] = jnp.sum(cls_acc[...])
        reg_sum_ref[0, 0] = jnp.sum(reg_acc[...])


# --------------------------------------------------------------------------- #
# Tiling helpers
# --------------------------------------------------------------------------- #
def _round_up(x, m):
    return -(-x // m) * m


def _padded_rows_bytes(rows, itemsize):
    """Bytes of one lane-column of a (rows, T) VMEM tile after sublane padding
    (second-minor dim pads to a full 32-byte-deep sublane tile)."""
    mult = max(8, 32 // max(itemsize, 1))
    return _round_up(rows, mult) * itemsize


def _num_tensorcores():
    """Best-effort TensorCores-per-chip (2 on v7x). Defaults to 1 (safe)."""
    try:
        info = pltpu.get_tpu_info()
        for name in ("num_cores_per_chip", "cores_per_chip", "num_tensorcores",
                     "tensorcore_count", "num_cores"):
            v = getattr(info, name, None)
            if isinstance(v, int) and 1 <= v <= 8:
                return v
    except Exception:
        pass
    return 1


def _vmem_limits():
    """(tile working-set budget, vmem_limit_bytes) sized per generation:
    v7x has 64 MiB physical VMEM per TC, v5e/v6e have 128 MiB."""
    try:
        cap = int(pltpu.get_tpu_info().vmem_capacity_bytes)
    except Exception:
        cap = 128 * 1024 * 1024
    vmem_limit = min(64 * 1024 * 1024, (cap * 3) // 5)
    return (vmem_limit * 3) // 4, vmem_limit


def _choose_tile(hw, t_max):
    """Lane tile T (multiple of 128, <= t_max) minimizing streamed padded lanes
    plus a ~0.35us fixed per-grid-step overhead (~1k lanes of HBM time at this
    kernel's bytes/lane)."""
    t_max = max(128, (t_max // 128) * 128)
    step_overhead_lanes = 1024
    best_t, best_cost = 128, None
    for t in range(128, t_max + 1, 128):
        hwp = _round_up(hw, t)
        cost = hwp + (hwp // t) * step_overhead_lanes
        if best_cost is None or cost < best_cost:
            best_t, best_cost = t, cost
    return best_t


# --------------------------------------------------------------------------- #
# Wrapper
# --------------------------------------------------------------------------- #
def focal_loss(center_mask, center_cls_targets, center_reg_targets,
               center_cls_preds, center_reg_preds, num_classes=NUM_CLASSES):
    """center_mask: (B, H, W); cls: (B, C, H, W); reg: (B, 4, H, W)."""
    B, H, W = center_mask.shape
    C = center_cls_targets.shape[1]
    assert C == num_classes
    HW = H * W

    # Keep native dtypes on the HBM side; cast to f32 inside the kernel.
    mask3 = center_mask.reshape(B, 1, HW)
    cls_t = center_cls_targets.reshape(B, C, HW)
    cls_p = center_cls_preds.reshape(B, C, HW)
    reg_t = center_reg_targets.reshape(B, 4, HW)
    reg_p = center_reg_preds.reshape(B, 4, HW)

    # ---- tiling: generation-aware VMEM budget, padded-layout bytes/lane ---- #
    budget, vmem_limit = _vmem_limits()
    in_bytes_per_lane = B * (
        _padded_rows_bytes(C, cls_t.dtype.itemsize)
        + _padded_rows_bytes(C, cls_p.dtype.itemsize)
        + _padded_rows_bytes(4, reg_t.dtype.itemsize)
        + _padded_rows_bytes(4, reg_p.dtype.itemsize)
        + _padded_rows_bytes(1, mask3.dtype.itemsize))
    temps_per_lane = 8 * B * _round_up(C, 8) * 4       # f32 elementwise temps
    bytes_per_lane = int(1.25 * (2 * in_bytes_per_lane + temps_per_lane))
    t_max = min(8192, max(128, budget // bytes_per_lane))
    T = _choose_tile(HW, t_max)

    NP = 2 if _num_tensorcores() >= 2 else 1           # megacore only if 2 TCs
    HWp = _round_up(HW, NP * T)
    NT = HWp // (NP * T)

    # ---- pad HW so every block satisfies the (8,128) constraint ------------ #
    # Padding contributes exactly 0 to both losses: mask=0 kills the positive
    # and reg terms; cls_t=1 makes (1 - y_true)^4 == 0 in the negative term.
    pad = HWp - HW
    if pad:
        pw = ((0, 0), (0, 0), (0, pad))
        mask3 = jnp.pad(mask3, pw)
        cls_t = jnp.pad(cls_t, pw, constant_values=1)
        cls_p = jnp.pad(cls_p, pw)
        reg_t = jnp.pad(reg_t, pw)
        reg_p = jnp.pad(reg_p, pw)

    def hw_idx(p, t):
        return (0, 0, p * NT + t)

    in_specs = [
        pl.BlockSpec((B, 1, T), hw_idx),
        pl.BlockSpec((B, C, T), hw_idx),
        pl.BlockSpec((B, C, T), hw_idx),
        pl.BlockSpec((B, 4, T), hw_idx),
        pl.BlockSpec((B, 4, T), hw_idx),
    ]
    out_specs = (
        pl.BlockSpec((1, 1), lambda p, t: (p, 0), memory_space=pltpu.SMEM),
        pl.BlockSpec((1, 1), lambda p, t: (p, 0), memory_space=pltpu.SMEM),
    )

    cls_numel = B * C * HW        # divide by ORIGINAL numel (matches reference)
    reg_numel = B * 4 * HW
    cls_numel_p = B * C * HWp
    reg_numel_p = B * 4 * HWp
    cost = pl.CostEstimate(
        flops=22 * cls_numel_p + 5 * reg_numel_p,
        transcendentals=3 * cls_numel_p,
        bytes_accessed=(mask3.nbytes + cls_t.nbytes + cls_p.nbytes
                        + reg_t.nbytes + reg_p.nbytes + 2 * NP * 4),
    )

    cls_part, reg_part = pl.pallas_call(
        _focal_loss_kernel,
        out_shape=(jax.ShapeDtypeStruct((NP, 1), jnp.float32),
                   jax.ShapeDtypeStruct((NP, 1), jnp.float32)),
        grid=(NP, NT),
        in_specs=in_specs,
        out_specs=out_specs,
        scratch_shapes=[pltpu.VMEM((1, 1, T), jnp.float32),
                        pltpu.VMEM((1, 1, T), jnp.float32)],
        compiler_params=pltpu.CompilerParams(
            dimension_semantics=("parallel", "arbitrary"),
            vmem_limit_bytes=int(vmem_limit)),
        cost_estimate=cost,
    )(mask3, cls_t, cls_p, reg_t, reg_p)

    # Final scalar glue (negate, mean, add) stays in plain JAX.
    cls_loss = -1.0 * jnp.sum(cls_part) / cls_numel
    reg_loss = jnp.sum(reg_part) / reg_numel
    return cls_loss + reg_loss


# --------------------------------------------------------------------------- #
# Reference + test
# --------------------------------------------------------------------------- #
def _reference(center_mask, cls_t, reg_t, cls_p, reg_p):
    """Direct transliteration of the PyTorch module (power + clamp + log)."""
    B, C, H, W = cls_p.shape
    m_cls = jnp.broadcast_to(center_mask[:, None], (B, C, H, W)).reshape(-1)
    m_reg = jnp.broadcast_to(center_mask[:, None], (B, 4, H, W)).reshape(-1)
    yt = cls_t.reshape(-1).astype(jnp.float32)
    yp = cls_p.reshape(-1).astype(jnp.float32)
    sig = jax.nn.sigmoid(yp)
    pos = m_cls * jnp.power(1.0 - sig, ALPHA) * jax.nn.log_sigmoid(yp)
    neg = ((1.0 - m_cls) * jnp.power(1.0 - yt, BETA)
           * jnp.power(sig, ALPHA) * jnp.log(jnp.clip(1.0 - sig, 1e-8, 1.0)))
    cls_loss = -1.0 * jnp.sum(pos + neg) / yt.size
    rt = reg_t.reshape(-1).astype(jnp.float32)
    rp = reg_p.reshape(-1).astype(jnp.float32)
    reg_loss = jnp.sum(m_reg * jnp.square(rt - rp)) / rt.size
    return cls_loss + reg_loss


if __name__ == "__main__":
    key = jax.random.PRNGKey(0)
    B, C, H, W = 2, NUM_CLASSES, 16, 16
    k1, k2, k3, k4, k5 = jax.random.split(key, 5)

    center_mask = (jax.random.uniform(k1, (B, H, W)) > 0.9).astype(jnp.float32)
    center_cls_targets = jax.random.uniform(k2, (B, C, H, W), dtype=jnp.float32)
    center_reg_targets = jax.random.normal(k3, (B, 4, H, W), dtype=jnp.float32)
    center_cls_preds = jax.random.normal(k4, (B, C, H, W), dtype=jnp.float32)
    center_reg_preds = jax.random.normal(k5, (B, 4, H, W), dtype=jnp.float32)

    out = focal_loss(center_mask, center_cls_targets, center_reg_targets,
                     center_cls_preds, center_reg_preds)
    out = jax.block_until_ready(out)

    ref = _reference(center_mask, center_cls_targets, center_reg_targets,
                     center_cls_preds, center_reg_preds)
    np.testing.assert_allclose(np.asarray(out), np.asarray(ref),
                               rtol=1e-5, atol=1e-5)
    print("KERNEL_OK")
</pallas_src>

<mosaic_0001>
module attributes {stable_mosaic.version = 11 : i64} {
  func.func @_focal_loss_kernel(%arg0: i32, %arg1: i32, %arg2: memref<2x1x256xf32, #tpu.memory_space<vmem>>, %arg3: memref<2x21x256xf32, #tpu.memory_space<vmem>>, %arg4: memref<2x21x256xf32, #tpu.memory_space<vmem>>, %arg5: memref<2x4x256xf32, #tpu.memory_space<vmem>>, %arg6: memref<2x4x256xf32, #tpu.memory_space<vmem>>, %arg7: memref<1x1xf32, #tpu.memory_space<smem>>, %arg8: memref<1x1xf32, #tpu.memory_space<smem>>, %arg9: memref<1x1x256xf32, #tpu.memory_space<vmem>>, %arg10: memref<1x1x256xf32, #tpu.memory_space<vmem>>) attributes {dimension_semantics = [#tpu.dimension_semantics<parallel>, #tpu.dimension_semantics<arbitrary>], iteration_bounds = array<i64: 1, 1>, scalar_prefetch = 0 : i64, scratch_operands = 2 : i64, tpu.core_type = #tpu.core_type<tc>, window_params = [{transform_indices = @transform_0, window_bounds = array<i64: 2, 1, 256>}, {transform_indices = @transform_1, window_bounds = array<i64: 2, 21, 256>}, {transform_indices = @transform_2, window_bounds = array<i64: 2, 21, 256>}, {transform_indices = @transform_3, window_bounds = array<i64: 2, 4, 256>}, {transform_indices = @transform_4, window_bounds = array<i64: 2, 4, 256>}, {transform_indices = @transform_5, window_bounds = array<i64: 1, 1>}, {transform_indices = @transform_6, window_bounds = array<i64: 1, 1>}]} {
    %c0_i32 = arith.constant 0 : i32
    %0 = arith.cmpi eq, %arg1, %c0_i32 : i32
    %1 = arith.extui %0 : i1 to i32
    %c0_i32_0 = arith.constant 0 : i32
    %2 = arith.cmpi ne, %1, %c0_i32_0 : i32
    scf.if %2 {
      %cst_41 = arith.constant 0.000000e+00 : f32
      %66 = vector.broadcast %cst_41 : f32 to vector<1x1x256xf32>
      %c0_42 = arith.constant 0 : index
      %c0_43 = arith.constant 0 : index
      %c0_44 = arith.constant 0 : index
      %67 = vector.load %arg9[%c0_42, %c0_43, %c0_44] : memref<1x1x256xf32, #tpu.memory_space<vmem>>, vector<1x1x256xf32>
      tpu.vector_store %arg9[%c0_42, %c0_43, %c0_44], %66 {strides = array<i32>} : memref<1x1x256xf32, #tpu.memory_space<vmem>>, vector<1x1x256xf32>,
      %cst_45 = arith.constant 0.000000e+00 : f32
      %68 = vector.broadcast %cst_45 : f32 to vector<1x1x256xf32>
      %c0_46 = arith.constant 0 : index
      %c0_47 = arith.constant 0 : index
      %c0_48 = arith.constant 0 : index
      %69 = vector.load %arg10[%c0_46, %c0_47, %c0_48] : memref<1x1x256xf32, #tpu.memory_space<vmem>>, vector<1x1x256xf32>
      tpu.vector_store %arg10[%c0_46, %c0_47, %c0_48], %68 {strides = array<i32>} : memref<1x1x256xf32, #tpu.memory_space<vmem>>, vector<1x1x256xf32>,
    } else {
    }
    %c0 = arith.constant 0 : index
    %c0_1 = arith.constant 0 : index
    %c0_2 = arith.constant 0 : index
    %3 = vector.load %arg2[%c0, %c0_1, %c0_2] : memref<2x1x256xf32, #tpu.memory_space<vmem>>, vector<2x1x256xf32>
    %cst = arith.constant 1.000000e+00 : f32
    %4 = vector.broadcast %cst : f32 to vector<2x1x256xf32>
    %5 = arith.subf %4, %3 : vector<2x1x256xf32>
    %c0_3 = arith.constant 0 : index
    %c0_4 = arith.constant 0 : index
    %c0_5 = arith.constant 0 : index
    %6 = vector.load %arg4[%c0_3, %c0_4, %c0_5] : memref<2x21x256xf32, #tpu.memory_space<vmem>>, vector<2x21x256xf32>
    %c0_6 = arith.constant 0 : index
    %c0_7 = arith.constant 0 : index
    %c0_8 = arith.constant 0 : index
    %7 = vector.load %arg3[%c0_6, %c0_7, %c0_8] : memref<2x21x256xf32, #tpu.memory_space<vmem>>, vector<2x21x256xf32>
    %8 = math.absf %6 : vector<2x21x256xf32>
    %cst_9 = arith.constant 0.000000e+00 : f32
    %9 = vector.broadcast %cst_9 : f32 to vector<2x21x256xf32>
    %10 = arith.subf %9, %8 : vector<2x21x256xf32>
    %11 = math.exp %10 : vector<2x21x256xf32>
    %12 = math.log1p %11 : vector<2x21x256xf32>
    %cst_10 = arith.constant 1.000000e+00 : f32
    %13 = vector.broadcast %cst_10 : f32 to vector<2x21x256xf32>
    %14 = arith.addf %13, %11 : vector<2x21x256xf32>
    %cst_11 = arith.constant 1.000000e+00 : f32
    %15 = vector.broadcast %cst_11 : f32 to vector<2x21x256xf32>
    %16 = arith.divf %15, %14 : vector<2x21x256xf32>
    %cst_12 = arith.constant 0.000000e+00 : f32
    %17 = vector.broadcast %cst_12 : f32 to vector<2x21x256xf32>
    %18 = arith.cmpf oge, %6, %17 : vector<2x21x256xf32>
    %19 = arith.mulf %11, %16 : vector<2x21x256xf32>
    %20 = arith.select %18, %16, %19 : vector<2x21x256xi1>, vector<2x21x256xf32>
    %cst_13 = arith.constant 0.000000e+00 : f32
    %21 = vector.broadcast %cst_13 : f32 to vector<2x21x256xf32>
    %22 = arith.minimumf %6, %21 : vector<2x21x256xf32>
    %23 = arith.subf %22, %12 : vector<2x21x256xf32>
    %cst_14 = arith.constant 0.000000e+00 : f32
    %24 = vector.broadcast %cst_14 : f32 to vector<2x21x256xf32>
    %25 = arith.subf %24, %6 : vector<2x21x256xf32>
    %cst_15 = arith.constant 0.000000e+00 : f32
    %26 = vector.broadcast %cst_15 : f32 to vector<2x21x256xf32>
    %27 = arith.minimumf %25, %26 : vector<2x21x256xf32>
    %28 = arith.subf %27, %12 : vector<2x21x256xf32>
    %cst_16 = arith.constant -18.420681 : f32
    %29 = vector.broadcast %cst_16 : f32 to vector<2x21x256xf32>
    %30 = arith.maximumf %28, %29 : vector<2x21x256xf32>
    %cst_17 = arith.constant 1.000000e+00 : f32
    %31 = vector.broadcast %cst_17 : f32 to vector<2x21x256xf32>
    %32 = arith.subf %31, %20 : vector<2x21x256xf32>
    %33 = arith.mulf %32, %32 : vector<2x21x256xf32>
    %34 = vector.broadcast %3 : vector<2x1x256xf32> to vector<2x21x256xf32>
    %35 = arith.mulf %34, %33 : vector<2x21x256xf32>
    %36 = arith.mulf %35, %23 : vector<2x21x256xf32>
    %cst_18 = arith.constant 1.000000e+00 : f32
    %37 = vector.broadcast %cst_18 : f32 to vector<2x21x256xf32>
    %38 = arith.subf %37, %7 : vector<2x21x256xf32>
    %39 = arith.mulf %38, %38 : vector<2x21x256xf32>
    %40 = arith.mulf %39, %39 : vector<2x21x256xf32>
    %41 = vector.broadcast %5 : vector<2x1x256xf32> to vector<2x21x256xf32>
    %42 = arith.mulf %41, %40 : vector<2x21x256xf32>
    %43 = arith.mulf %20, %20 : vector<2x21x256xf32>
    %44 = arith.mulf %42, %43 : vector<2x21x256xf32>
    %45 = arith.mulf %44, %30 : vector<2x21x256xf32>
    %46 = arith.addf %36, %45 : vector<2x21x256xf32>
    %c0_19 = arith.constant 0 : index
    %c0_20 = arith.constant 0 : index
    %c0_21 = arith.constant 0 : index
    %47 = vector.load %arg5[%c0_19, %c0_20, %c0_21] : memref<2x4x256xf32, #tpu.memory_space<vmem>>, vector<2x4x256xf32>
    %c0_22 = arith.constant 0 : index
    %c0_23 = arith.constant 0 : index
    %c0_24 = arith.constant 0 : index
    %48 = vector.load %arg6[%c0_22, %c0_23, %c0_24] : memref<2x4x256xf32, #tpu.memory_space<vmem>>, vector<2x4x256xf32>
    %49 = arith.subf %47, %48 : vector<2x4x256xf32>
    %50 = arith.mulf %49, %49 : vector<2x4x256xf32>
    %51 = vector.broadcast %3 : vector<2x1x256xf32> to vector<2x4x256xf32>
    %52 = arith.mulf %51, %50 : vector<2x4x256xf32>
    %c0_25 = arith.constant 0 : index
    %c0_26 = arith.constant 0 : index
    %c0_27 = arith.constant 0 : index
    %53 = vector.load %arg9[%c0_25, %c0_26, %c0_27] : memref<1x1x256xf32, #tpu.memory_space<vmem>>, vector<1x1x256xf32>
    %cst_28 = arith.constant dense<0.000000e+00> : vector<256xf32>
    %54 = vector.multi_reduction <add>, %46, %cst_28 [0, 1] : vector<2x21x256xf32> to vector<256xf32>
    %55 = vector.shape_cast %54 : vector<256xf32> to vector<1x1x256xf32>
    %56 = arith.addf %53, %55 : vector<1x1x256xf32>
    %c0_29 = arith.constant 0 : index
    %c0_30 = arith.constant 0 : index
    %c0_31 = arith.constant 0 : index
    %57 = vector.load %arg9[%c0_29, %c0_30, %c0_31] : memref<1x1x256xf32, #tpu.memory_space<vmem>>, vector<1x1x256xf32>
    tpu.vector_store %arg9[%c0_29, %c0_30, %c0_31], %56 {strides = array<i32>} : memref<1x1x256xf32, #tpu.memory_space<vmem>>, vector<1x1x256xf32>,
    %c0_32 = arith.constant 0 : index
    %c0_33 = arith.constant 0 : index
    %c0_34 = arith.constant 0 : index
    %58 = vector.load %arg10[%c0_32, %c0_33, %c0_34] : memref<1x1x256xf32, #tpu.memory_space<vmem>>, vector<1x1x256xf32>
    %cst_35 = arith.constant dense<0.000000e+00> : vector<256xf32>
    %59 = vector.multi_reduction <add>, %52, %cst_35 [0, 1] : vector<2x4x256xf32> to vector<256xf32>
    %60 = vector.shape_cast %59 : vector<256xf32> to vector<1x1x256xf32>
    %61 = arith.addf %58, %60 : vector<1x1x256xf32>
    %c0_36 = arith.constant 0 : index
    %c0_37 = arith.constant 0 : index
    %c0_38 = arith.constant 0 : index
    %62 = vector.load %arg10[%c0_36, %c0_37, %c0_38] : memref<1x1x256xf32, #tpu.memory_space<vmem>>, vector<1x1x256xf32>
    tpu.vector_store %arg10[%c0_36, %c0_37, %c0_38], %61 {strides = array<i32>} : memref<1x1x256xf32, #tpu.memory_space<vmem>>, vector<1x1x256xf32>,
    %c0_i32_39 = arith.constant 0 : i32
    %63 = arith.cmpi eq, %arg1, %c0_i32_39 : i32
    %64 = arith.extui %63 : i1 to i32
    %c0_i32_40 = arith.constant 0 : i32
    %65 = arith.cmpi ne, %64, %c0_i32_40 : i32
    scf.if %65 {
      %c0_41 = arith.constant 0 : index
      %c0_42 = arith.constant 0 : index
      %c0_43 = arith.constant 0 : index
      %66 = vector.load %arg9[%c0_41, %c0_42, %c0_43] : memref<1x1x256xf32, #tpu.memory_space<vmem>>, vector<1x1x256xf32>
      %67 = vector.shape_cast %66 : vector<1x1x256xf32> to vector<1x1x1x256xf32>
      %cst_44 = arith.constant dense<0.000000e+00> : vector<1xf32>
      %68 = vector.multi_reduction <add>, %67, %cst_44 [1, 2, 3] : vector<1x1x1x256xf32> to vector<1xf32>
      %69 = vector.shape_cast %68 : vector<1xf32> to vector<1x1x1x1xf32>
      %70 = vector.extract %69[0, 0, 0, 0] : f32 from vector<1x1x1x1xf32>
      %c0_45 = arith.constant 0 : index
      %c0_46 = arith.constant 0 : index
      %71 = memref.load %arg7[%c0_45, %c0_46] : memref<1x1xf32, #tpu.memory_space<smem>>
      memref.store %70, %arg7[%c0_45, %c0_46] : memref<1x1xf32, #tpu.memory_space<smem>>
      %c0_47 = arith.constant 0 : index
      %c0_48 = arith.constant 0 : index
      %c0_49 = arith.constant 0 : index
      %72 = vector.load %arg10[%c0_47, %c0_48, %c0_49] : memref<1x1x256xf32, #tpu.memory_space<vmem>>, vector<1x1x256xf32>
      %73 = vector.shape_cast %72 : vector<1x1x256xf32> to vector<1x1x1x256xf32>
      %cst_50 = arith.constant dense<0.000000e+00> : vector<1xf32>
      %74 = vector.multi_reduction <add>, %73, %cst_50 [1, 2, 3] : vector<1x1x1x256xf32> to vector<1xf32>
      %75 = vector.shape_cast %74 : vector<1xf32> to vector<1x1x1x1xf32>
      %76 = vector.extract %75[0, 0, 0, 0] : f32 from vector<1x1x1x1xf32>
      %c0_51 = arith.constant 0 : index
      %c0_52 = arith.constant 0 : index
      %77 = memref.load %arg8[%c0_51, %c0_52] : memref<1x1xf32, #tpu.memory_space<smem>>
      memref.store %76, %arg8[%c0_51, %c0_52] : memref<1x1xf32, #tpu.memory_space<smem>>
    } else {
    }
    return
  }
  func.func @transform_0(%arg0: i32, %arg1: i32) -> (i32, i32, i32) {
    %c1_i32 = arith.constant 1 : i32
    %0 = arith.muli %arg0, %c1_i32 : i32
    %1 = arith.addi %0, %arg1 : i32
    %c0_i32 = arith.constant 0 : i32
    %c0_i32_0 = arith.constant 0 : i32
    %c0_i32_1 = arith.constant 0 : i32
    return %c0_i32, %c0_i32_0, %1 : i32, i32, i32
  }
  func.func @transform_1(%arg0: i32, %arg1: i32) -> (i32, i32, i32) {
    %c1_i32 = arith.constant 1 : i32
    %0 = arith.muli %arg0, %c1_i32 : i32
    %1 = arith.addi %0, %arg1 : i32
    %c0_i32 = arith.constant 0 : i32
    %c0_i32_0 = arith.constant 0 : i32
    %c0_i32_1 = arith.constant 0 : i32
    return %c0_i32, %c0_i32_0, %1 : i32, i32, i32
  }
  func.func @transform_2(%arg0: i32, %arg1: i32) -> (i32, i32, i32) {
    %c1_i32 = arith.constant 1 : i32
    %0 = arith.muli %arg0, %c1_i32 : i32
    %1 = arith.addi %0, %arg1 : i32
    %c0_i32 = arith.constant 0 : i32
    %c0_i32_0 = arith.constant 0 : i32
    %c0_i32_1 = arith.constant 0 : i32
    return %c0_i32, %c0_i32_0, %1 : i32, i32, i32
  }
  func.func @transform_3(%arg0: i32, %arg1: i32) -> (i32, i32, i32) {
    %c1_i32 = arith.constant 1 : i32
    %0 = arith.muli %arg0, %c1_i32 : i32
    %1 = arith.addi %0, %arg1 : i32
    %c0_i32 = arith.constant 0 : i32
    %c0_i32_0 = arith.constant 0 : i32
    %c0_i32_1 = arith.constant 0 : i32
    return %c0_i32, %c0_i32_0, %1 : i32, i32, i32
  }
  func.func @transform_4(%arg0: i32, %arg1: i32) -> (i32, i32, i32) {
    %c1_i32 = arith.constant 1 : i32
    %0 = arith.muli %arg0, %c1_i32 : i32
    %1 = arith.addi %0, %arg1 : i32
    %c0_i32 = arith.constant 0 : i32
    %c0_i32_0 = arith.constant 0 : i32
    %c0_i32_1 = arith.constant 0 : i32
    return %c0_i32, %c0_i32_0, %1 : i32, i32, i32
  }
  func.func @transform_5(%arg0: i32, %arg1: i32) -> (i32, i32) {
    %c0_i32 = arith.constant 0 : i32
    %c0_i32_0 = arith.constant 0 : i32
    return %arg0, %c0_i32 : i32, i32
  }
  func.func @transform_6(%arg0: i32, %arg1: i32) -> (i32, i32) {
    %c0_i32 = arith.constant 0 : i32
    %c0_i32_0 = arith.constant 0 : i32
    return %arg0, %c0_i32 : i32, i32
  }
}

</mosaic_0001>

<bundles_post_ra>
// kernel: tpu_custom_call.1
= control target key start
LH: loop header
LB: loop body
LE: loop exit
PB: predicated region body
PF: predicated region fallthrough
CT: control target
= control target key end

     0   :  { %12 = vsyncpa [#allocation5], 0  ;;  %s1900_s0 = inlined_call_operand.hbm [shape: f32[2,1,256], index: 0, kind: input, shape index: {}]   ;;  %s1901_s1 = inlined_call_operand.hbm [shape: f32[2,21,256], index: 1, kind: input, shape index: {}]   ;;  %s1902_s2 = inlined_call_operand.hbm [shape: f32[2,21,256], index: 2, kind: input, shape index: {}]   ;;  %s1903_s3 = inlined_call_operand.hbm [shape: f32[2,4,256], index: 3, kind: input, shape index: {}]   ;;  %s1904_s4 = inlined_call_operand.hbm [shape: f32[2,4,256], index: 4, kind: input, shape index: {}]   ;;  %s1905_s5 = inlined_call_operand.hbm [shape: f32[1,1], index: 5, kind: output, shape index: {0}]   ;;  %s1906_s6 = inlined_call_operand.hbm [shape: f32[1,1], index: 6, kind: output, shape index: {1}]  }
   0x1   :  { %13 = vsyncpa [#allocation8], 0 }
   0x2   :  { %14 = vsyncpa [#allocation11], 0 }
   0x3   :  { %15 = vsyncpa [#allocation6], 0 }
   0x4   :  { %16 = vsyncpa [#allocation15], 0  ;;  %s1073_s21 = smov [#allocation7]   ;;  %s933_s25 = scalar_lea.hbm %s1901_s1, 1536 }
   0x5   :  { %s42_s22 = sshll.u32 %s1073_s21, 4  ;;  %p934_p0 = scmp.ne.s32.totalorder %s1901_s1, %s933_s25  ;;  %s43_s22 = int_to_ptr.vmem [resolvable:$true] %s42_s22 }
   0x6   :  { %p937_p1 = scmp.lt.u32.totalorder %s933_s25, %s1901_s1 }
   0x8   :  { %p939_p2 = pnand %p937_p1, %p934_p0 }
   0xa   :  { %942 = shalt.err (!%p939_p2)
}
   0xb   :  { %s943_s30 = scalar_lea.vmem %s43_s22, 1536  ;;  %p948_p4 = scmp.lt.s32.totalorder %s43_s22, %s43_s22 }
   0xc   :  { %p944_p3 = scmp.ne.s32.totalorder %s43_s22, %s943_s30  ;;  %p949_p5 = scmp.lt.s32.totalorder %s943_s30, %s943_s30 }
   0xe   :  { %p950_p6 = por %p949_p5, %p948_p4 }
  0x10   :  { %p951_p7 = pnand %p950_p6, %p944_p3 }
  0x12   :  { %954 = shalt.err (!%p951_p7)
}
  0x13   :  { %s1074_s7 = smov 256   ;;  %s1075_s8 = smov 16  }
  0x14   :  { %48 = dma.hbm_to_vmem [thread:$0]  %s1901_s1, 1536, %s43_s22, [#allocation8], %s1074_s7, %s1074_s7, %s1075_s8  }
  0x15   :  { %s1076_s11 = smov [#allocation10]   ;;  %s955_s15 = scalar_lea.hbm %s1903_s3, 256 }
  0x16   :  { %s74_s12 = sshll.u32 %s1076_s11, 4  ;;  %p956_p8 = scmp.ne.s32.totalorder %s1903_s3, %s955_s15  ;;  %s75_s12 = int_to_ptr.vmem [resolvable:$true] %s74_s12 }
  0x17   :  { %p959_p9 = scmp.lt.u32.totalorder %s955_s15, %s1903_s3 }
  0x19   :  { %p961_p10 = pnand %p959_p9, %p956_p8 }
  0x1b   :  { %964 = shalt.err (!%p961_p10)
}
  0x1c   :  { %s965_s20 = scalar_lea.vmem %s75_s12, 256  ;;  %p970_p12 = scmp.lt.s32.totalorder %s75_s12, %s75_s12 }
  0x1d   :  { %p966_p11 = scmp.ne.s32.totalorder %s75_s12, %s965_s20  ;;  %p971_p13 = scmp.lt.s32.totalorder %s965_s20, %s965_s20 }
  0x1f   :  { %p972_p0 = por %p971_p13, %p970_p12 }
  0x21   :  { %p973_p1 = pnand %p972_p0, %p966_p11 }
  0x23   :  { %976 = shalt.err (!%p973_p1)
}
  0x24   :  { %s1077_s1 = smov 128   ;;  %s1078_s21 = smov 8  }
  0x25   :  { %80 = dma.hbm_to_vmem [thread:$0]  %s1903_s3, 256, %s75_s12, [#allocation11], %s1077_s1, %s1077_s1, %s1078_s21  }
  0x26   :  { %s1079_s24 = smov [#allocation4]   ;;  %s977_s28 = scalar_lea.hbm %s1900_s0, 64 }
  0x27   :  { %s26_s25 = sshll.u32 %s1079_s24, 4  ;;  %p978_p2 = scmp.ne.s32.totalorder %s1900_s0, %s977_s28  ;;  %s27_s25 = int_to_ptr.vmem [resolvable:$true] %s26_s25 }
  0x28   :  { %p981_p3 = scmp.lt.u32.totalorder %s977_s28, %s1900_s0 }
  0x2a   :  { %p983_p4 = pnand %p981_p3, %p978_p2 }
  0x2c   :  { %986 = shalt.err (!%p983_p4)
}
  0x2d   :  { %s987_s11 = scalar_lea.vmem %s27_s25, 64  ;;  %p992_p6 = scmp.lt.s32.totalorder %s27_s25, %s27_s25 }
  0x2e   :  { %p988_p5 = scmp.ne.s32.totalorder %s27_s25, %s987_s11  ;;  %p993_p7 = scmp.lt.s32.totalorder %s987_s11, %s987_s11 }
  0x30   :  { %p994_p8 = por %p993_p7, %p992_p6 }
  0x32   :  { %p995_p9 = pnand %p994_p8, %p988_p5 }
  0x34   :  { %998 = shalt.err (!%p995_p9)
}
  0x35   :  { %s1080_s3 = smov 32   ;;  %s1081_s12 = smov 2  }
  0x36   :  { %32 = dma.hbm_to_vmem [thread:$0]  %s1900_s0, 64, %s27_s25, [#allocation5], %s1080_s3, %s1080_s3, %s1081_s12  }
  0x37   :  { %s1082_s15 = smov [#allocation9]   ;;  %s1083_s17 = smov [#allocation12]  }
  0x38   :  { %s58_s16 = sshll.u32 %s1082_s15, 4  ;;  %s90_s18 = sshll.u32 %s1083_s17, 4  ;;  %s59_s16 = int_to_ptr.vmem [resolvable:$true] %s58_s16  ;;  %s91_s18 = int_to_ptr.vmem [resolvable:$true] %s90_s18 }
  0x39   :  { %s999_s22 = scalar_lea.hbm %s1902_s2, 1536 }
  0x3a   :  { %p1000_p10 = scmp.ne.s32.totalorder %s1902_s2, %s999_s22  ;;  %p1003_p11 = scmp.lt.u32.totalorder %s999_s22, %s1902_s2 }
  0x3c   :  { %p1005_p12 = pnand %p1003_p11, %p1000_p10 }
  0x3e   :  { %1008 = shalt.err (!%p1005_p12)
}
  0x3f   :  { %s1009_s0 = scalar_lea.vmem %s59_s16, 1536  ;;  %p1014_p0 = scmp.lt.s32.totalorder %s59_s16, %s59_s16 }
  0x40   :  { %p1010_p13 = scmp.ne.s32.totalorder %s59_s16, %s1009_s0  ;;  %p1015_p1 = scmp.lt.s32.totalorder %s1009_s0, %s1009_s0 }
  0x42   :  { %p1016_p2 = por %p1015_p1, %p1014_p0 }
  0x44   :  { %p1017_p3 = pnand %p1016_p2, %p1010_p13 }
  0x46   :  { %1020 = shalt.err (!%p1017_p3)
}
  0x47   :  { %64 = dma.hbm_to_vmem [thread:$0]  %s1902_s2, 1536, %s59_s16, [#allocation8], %s1074_s7, %s1074_s7, %s1075_s8  }
  0x48   :  { %s1021_s9 = scalar_lea.hbm %s1904_s4, 256 }
  0x49   :  { %p1022_p4 = scmp.ne.s32.totalorder %s1904_s4, %s1021_s9  ;;  %p1025_p5 = scmp.lt.u32.totalorder %s1021_s9, %s1904_s4 }
  0x4b   :  { %p1027_p6 = pnand %p1025_p5, %p1022_p4 }
  0x4d   :  { %1030 = shalt.err (!%p1027_p6)
}
  0x4e   :  { %s1031_s13 = scalar_lea.vmem %s91_s18, 256  ;;  %p1036_p8 = scmp.lt.s32.totalorder %s91_s18, %s91_s18 }
  0x4f   :  { %p1032_p7 = scmp.ne.s32.totalorder %s91_s18, %s1031_s13  ;;  %p1037_p9 = scmp.lt.s32.totalorder %s1031_s13, %s1031_s13 }
  0x51   :  { %p1038_p10 = por %p1037_p9, %p1036_p8 }
  0x53   :  { %p1039_p11 = pnand %p1038_p10, %p1032_p7 }
  0x55   :  { %1042 = shalt.err (!%p1039_p11)
}
  0x56   :  { %96 = dma.hbm_to_vmem [thread:$0]  %s1904_s4, 256, %s91_s18, [#allocation11], %s1077_s1, %s1077_s1, %s1078_s21  }
  0x57   :  { %1063 = dma.done.wait [#allocation5], 64  }
  0x58   :  { %1064 = vsyncadd [#allocation5], 4294967232 }
  0x59   :  { %1065 = dma.done.wait [#allocation8], 3072  }
  0x5a   :  { %1066 = vsyncadd [#allocation8], 4294964224 }
  0x5b   :  { %1067 = dma.done.wait [#allocation11], 512  }
  0x5c   :  { %1068 = vsyncadd [#allocation11], 4294966784  ;;  %v126_v0 = vlaneseq  ;;  %v1929_v1 = vmov 0  ;;  %v1084_v2 = vmov 0.0   ;;  %v1203_v3 = vld [vmem:[#allocation9] sm:$0xff]  ;;  %v1205_v4 = vld [vmem:[#allocation9 + $0x8] sm:$0xff] }
  0x5d   :  { %v132_v6 = vld [vmem:[#allocation4] sm:$0x3]  ;;  %v1209_v7 = vld [vmem:[#allocation9 + $0x10] sm:$0xff]  ;;  %v133_v8 = vld [vmem:[#allocation4 + $0x2] sm:$0x3]  ;;  %vm352_vm13 = vcmp.ge.f32.partialorder %v1203_v3, 0.0 }
  0x5e   :  { %vm1195_vm0 = vcmp.lt.s32.totalorder %v126_v0, 256  ;;  %v1207_v5 = vshrl.u32 %v126_v0, 7  ;;  %v1211_v9 = vld [vmem:[#allocation9 + $0x18] sm:$0xff]  ;;  %v1213_v10 = vld [vmem:[#allocation9 + $0x20] sm:$0x1f]  ;;  %v134_v17 = vsub.f32 1.0, %v132_v6 }
  0x5f   :  { %v1930_v1 = vsel %vm1195_vm0, 4294967295, %v1929_v1  ;;  %130 = vst.msk [vmem:[#allocation2] sm:$0x3] %vm1195_vm0, %v1084_v2  ;;  %131 = vst.msk [vmem:[#allocation3] sm:$0x3] %vm1195_vm0, %v1084_v2  ;;  %v135_v18 = vsub.f32 1.0, %v133_v8 }
  0x60   :  { %1931 = vst [vmem:[#allocation21_spill] sm:$0xff] %v1930_v1  ;;  %1932 = vst [vmem:[#allocation22_spill] sm:$0xff] %v1207_v5  ;;  %v1215_v11 = vld [vmem:[#allocation9 + $0x28] sm:$0x1f]  ;;  %v160_v12 = vand.u32 2147483647, %v1203_v3 }
  0x61   :  { %v161_v13 = vand.u32 2147483647, %v1205_v4  ;;  %v162_v14 = vand.u32 2147483647, %v1209_v7  ;;  %v1221_v15 = vsub.s32 0, %v1207_v5  ;;  %v1224_v16 = vsub.s32 1, %v1207_v5 }
  0x62   :  { %v1226_v19 = vld [vmem:[#allocation9 + $0x30] sm:$0xff]  ;;  %v1228_v20 = vld [vmem:[#allocation9 + $0x38] sm:$0xff]  ;;  %v163_v21 = vand.u32 2147483647, %v1211_v9  ;;  %v1231_v22 = vld [vmem:[#allocation9 + $0x40] sm:$0xff]  ;;  %v172_v28 = vsub.f32 0.0, %v160_v12 }
  0x63   :  { %1933 = vst [vmem:[#allocation23_spill] sm:$0xff] %v1221_v15  ;;  %1934 = vst [vmem:[#allocation24_spill] sm:$0xff] %v1224_v16  ;;  %v1233_v23 = vld [vmem:[#allocation9 + $0x48] sm:$0xff]  ;;  %v164_v24 = vand.u32 2147483647, %v1213_v10  ;;  %v173_v29 = vsub.f32 0.0, %v161_v13  ;;  %v1246_v37 = vrot.slane %v132_v6, %v1221_v15  ;;  %v1251_v41 = vrot.slane %v132_v6, %v1224_v16 }
  0x64   :  { %v165_v25 = vand.u32 2147483647, %v1215_v11  ;;  %v1237_v26 = vld [vmem:[#allocation9 + $0x50] sm:$0x1f]  ;;  %v1239_v27 = vld [vmem:[#allocation9 + $0x58] sm:$0x1f]  ;;  %v1254_v45 = vrot.slane %v133_v8, %v1221_v15  ;;  %v1257_v49 = vrot.slane %v133_v8, %v1224_v16  ;;  %v1260_v57 = vrot.slane %v134_v17, %v1221_v15 }
  0x65   :  { %v166_v30 = vand.u32 2147483647, %v1226_v19  ;;  %v167_v31 = vand.u32 2147483647, %v1228_v20  ;;  %v174_v32 = vsub.f32 0.0, %v162_v14  ;;  %v175_v33 = vsub.f32 0.0, %v163_v21 }
  0x66   :  { %v168_v34 = vand.u32 2147483647, %v1231_v22  ;;  %v169_v35 = vand.u32 2147483647, %v1233_v23  ;;  %v176_v36 = vsub.f32 0.0, %v164_v24  ;;  %1935 = vst [vmem:[#allocation25_spill] sm:$0xff] %v1246_v37  ;;  %v1263_v59 = vrot.slane %v134_v17, %v1224_v16 }
  0x67   :  { %v170_v38 = vand.u32 2147483647, %v1237_v26  ;;  %v171_v39 = vand.u32 2147483647, %v1239_v27  ;;  %v177_v40 = vsub.f32 0.0, %v165_v25  ;;  %1936 = vst [vmem:[#allocation26_spill] sm:$0xff] %v1251_v41  ;;  %v1266_v60 = vrot.slane %v135_v18, %v1221_v15 }
  0x68   :  { %v184_v42 = vmul.f32 1.442695, %v172_v28  ;;  %v186_v43 = vmul.f32 1.442695, %v173_v29  ;;  %v188_v44 = vmul.f32 1.442695, %v174_v32  ;;  %v1269_v0 = vrot.slane %v135_v18, %v1224_v16 }
  0x69   :  { %1937 = vst [vmem:[#allocation27_spill] sm:$0xff] %v1254_v45  ;;  %v178_v46 = vsub.f32 0.0, %v166_v30  ;;  %v179_v47 = vsub.f32 0.0, %v167_v31  ;;  %v190_v48 = vmul.f32 1.442695, %v175_v33  ;;  %1938 = vst [vmem:[#allocation28_spill] sm:$0xff] %v1257_v49 }
  0x6a   :  { %v180_v50 = vsub.f32 0.0, %v168_v34  ;;  %v181_v51 = vsub.f32 0.0, %v169_v35  ;;  %861 = vpow2.f32 %v184_v42  ;;  %v192_v52 = vmul.f32 1.442695, %v176_v36  ;;  %v648_v53 = vld [vmem:[#allocation10] sm:$0xff]  ;;  %v650_v54 = vld [vmem:[#allocation12] sm:$0xff] }
  0x6b   :  { %v182_v55 = vsub.f32 0.0, %v170_v38  ;;  %v183_v56 = vsub.f32 0.0, %v171_v39  ;;  %863 = vpow2.f32 %v186_v43  ;;  %1939 = vst [vmem:[#allocation29_spill] sm:$0xff] %v1260_v57  ;;  %v194_v58 = vmul.f32 1.442695, %v177_v40  ;;  %1940 = vst [vmem:[#allocation30_spill] sm:$0xff] %v1263_v59 }
  0x6c   :  { %865 = vpow2.f32 %v188_v44  ;;  %1941 = vst [vmem:[#allocation31_spill] sm:$0xff] %v1266_v60  ;;  %v649_v61 = vld [vmem:[#allocation10 + $0x8] sm:$0xff]  ;;  %v651_v62 = vld [vmem:[#allocation12 + $0x8] sm:$0xff]  ;;  %v196_v63 = vmul.f32 1.442695, %v178_v46  ;;  %1942 = vst [vmem:[#allocation32_spill] sm:$0xff] %v1269_v0  ;;  %v1271_v2 = vsub.f32 %v648_v53, %v650_v54 }
  0x6d   :  { %867 = vpow2.f32 %v190_v48  ;;  %v198_v6 = vmul.f32 1.442695, %v179_v47  ;;  %v200_v8 = vmul.f32 1.442695, %v180_v50  ;;  %v202_v12 = vmul.f32 1.442695, %v181_v51 }
  0x6e   :  { %1943 = vst [vmem:[#allocation33_spill] sm:$0xff] %v1271_v2  ;;  %869 = vpow2.f32 %v192_v52  ;;  %v204_v13 = vmul.f32 1.442695, %v182_v55  ;;  %v206_v14 = vmul.f32 1.442695, %v183_v56  ;;  %v1274_v21 = vsub.f32 %v649_v61, %v651_v62  ;;  %s1043_s21 = scalar_lea.hbm %s1905_s5, 16 }
  0x6f   :  { %871 = vpow2.f32 %v194_v58  ;;  %v1970_v60 = vmin.f32 %v1203_v3, 0.0  ;;  %vm353_vm14 = vcmp.ge.f32.partialorder %v1205_v4, 0.0  ;;  %vm354_vm15 = vcmp.ge.f32.partialorder %v1209_v7, 0.0  ;;  %p1044_p12 = scmp.ne.s32.totalorder %s1905_s5, %s1043_s21  ;;  %p1047_p13 = scmp.lt.u32.totalorder %s1043_s21, %s1905_s5 }
  0x70   :  { %1944 = vst [vmem:[#allocation34_spill] sm:$0xff] %v1274_v21  ;;  %873 = vpow2.f32 %v196_v63 }
  0x71   :  { %875 = vpow2.f32 %v198_v6  ;;  %p1049_p0 = pnand %p1047_p13, %p1044_p12 }
  0x72   :  { %877 = vpow2.f32 %v200_v8 }
  0x73   :  { %879 = vpow2.f32 %v202_v12 }
  0x74   :  { %v1288_v38 = vpop.eup %861  ;;  %881 = vpow2.f32 %v204_v13 }
  0x75   :  { %v1293_v43 = vpop.eup %863  ;;  %v1296_v44 = vadd.f32 1.0, %v1288_v38  ;;  %v211_v46 = vmul.f32 -0.5, %v1288_v38  ;;  %883 = vpow2.f32 %v206_v14  ;;  %v214_v54 = vand.u32 2147483647, %v1288_v38 }
  0x76   :  { %v1300_v48 = vpop.eup %865  ;;  %v1303_v50 = vadd.f32 1.0, %v1293_v43  ;;  %v220_v51 = vmul.f32 -0.5, %v1293_v43  ;;  %v223_v55 = vand.u32 2147483647, %v1293_v43 }
  0x77   :  { %v1307_v53 = vpop.eup %867  ;;  %885 = vlog2.f32 %v1296_v44  ;;  %v1313_v56 = vadd.f32 1.0, %v1300_v48  ;;  %v212_v61 = vadd.f32 1.0, %v211_v46  ;;  %v229_v63 = vmul.f32 -0.5, %v1300_v48 }
  0x78   :  { %v1315_v58 = vpop.eup %869  ;;  %887 = vlog2.f32 %v1303_v50  ;;  %v221_v62 = vadd.f32 1.0, %v220_v51  ;;  %v1321_v6 = vadd.f32 1.0, %v1307_v53  ;;  %v232_v35 = vand.u32 2147483647, %v1300_v48 }
  0x79   :  { %889 = vlog2.f32 %v1313_v56  ;;  %v1325_v13 = vpop.eup %871  ;;  %v230_v14 = vadd.f32 1.0, %v229_v63  ;;  %v238_v46 = vmul.f32 -0.5, %v1307_v53  ;;  %vm1332_vm1 = vcmp.lt.f32.partialorder %v214_v54, 0.0004427343 }
  0x7a   :  { %1945 = vst [vmem:[#allocation35_spill] sm:$0xff] %v1325_v13  ;;  %v1330_v52 = vpop.eup %873  ;;  %891 = vlog2.f32 %v1321_v6  ;;  %v241_v8 = vand.u32 2147483647, %v1307_v53  ;;  %v1339_v12 = vadd.f32 1.0, %v1315_v58  ;;  %v247_v63 = vmul.f32 -0.5, %v1315_v58 }
  0x7b   :  { %1946 = vst [vmem:[#allocation36_spill] sm:$0xff] %v1330_v52  ;;  %v1342_v47 = vpop.eup %875  ;;  %v213_v42 = vmul.f32 %v1288_v38, %v212_v61  ;;  %v222_v51 = vmul.f32 %v1293_v43, %v221_v62  ;;  %vm1346_vm2 = vcmp.lt.f32.partialorder %v223_v55, 0.0004427343  ;;  %v239_v40 = vadd.f32 1.0, %v238_v46 }
  0x7c   :  { %1949 = vst [vmem:[#allocation37_spill] sm:$0xff] %v1342_v47  ;;  %v1350_v33 = vpop.eup %877  ;;  %893 = vlog2.f32 %v1339_v12  ;;  %v250_v39 = vand.u32 2147483647, %v1315_v58  ;;  %v1355_v36 = vadd.f32 1.0, %v1325_v13  ;;  %v256_v32 = vmul.f32 -0.5, %v1325_v13 }
  0x7d   :  { %v1358_v31 = vpop.eup %879  ;;  %v231_v61 = vmul.f32 %v1300_v48, %v230_v14  ;;  %vm1361_vm3 = vcmp.lt.f32.partialorder %v232_v35, 0.0004427343  ;;  %v248_v62 = vadd.f32 1.0, %v247_v63  ;;  %v1366_v46 = vadd.f32 1.0, %v1330_v52 }
  0x7e   :  { %v1368_v30 = vpop.eup %881  ;;  %vm1370_vm4 = vcmp.lt.f32.partialorder %v241_v8, 0.0004427343  ;;  %895 = vlog2.f32 %v1355_v36  ;;  %v257_v28 = vadd.f32 1.0, %v256_v32  ;;  %v259_v18 = vand.u32 2147483647, %v1325_v13 }
  0x7f   :  { %v265_v35 = vmul.f32 -0.5, %v1330_v52  ;;  %v1377_v14 = vpop.eup %883  ;;  %v240_v63 = vmul.f32 %v1307_v53, %v239_v40  ;;  %897 = vlog2.f32 %v1366_v46  ;;  %v268_v25 = vand.u32 2147483647, %v1330_v52 }
  0x80   :  { %v1383_v8 = vadd.f32 1.0, %v1342_v47  ;;  %vm1385_vm5 = vcmp.lt.f32.partialorder %v250_v39, 0.0004427343  ;;  %v274_v16 = vmul.f32 -0.5, %v1342_v47  ;;  %v277_v15 = vand.u32 2147483647, %v1342_v47 }
  0x81   :  { %v886_v24 = vpop.eup %885  ;;  %v266_v32 = vadd.f32 1.0, %v265_v35  ;;  %v249_v40 = vmul.f32 %v1315_v58, %v248_v62  ;;  %v1394_v21 = vadd.f32 1.0, %v1350_v33  ;;  %v258_v39 = vmul.f32 %v1325_v13, %v257_v28 }
  0x82   :  { %v888_v1 = vpop.eup %887  ;;  %v210_v5 = vmul.f32 0.6931472, %v886_v24  ;;  %899 = vlog2.f32 %v1383_v8  ;;  %vm1397_vm6 = vcmp.lt.f32.partialorder %v259_v18, 0.0004427343  ;;  %vm1401_vm7 = vcmp.lt.f32.partialorder %v268_v25, 0.0004427343 }
  0x83   :  { %v890_v2 = vpop.eup %889  ;;  %v219_v0 = vmul.f32 0.6931472, %v888_v1  ;;  %v275_v59 = vadd.f32 1.0, %v274_v16  ;;  %901 = vlog2.f32 %v1394_v21  ;;  %v283_v62 = vmul.f32 -0.5, %v1350_v33 }
  0x84   :  { %v228_v24 = vmul.f32 0.6931472, %v890_v2  ;;  %v892_v57 = vpop.eup %891  ;;  %v267_v49 = vmul.f32 %v1330_v52, %v266_v32  ;;  %vm1408_vm8 = vcmp.lt.f32.partialorder %v277_v15, 0.0004427343  ;;  %v286_v18 = vand.u32 2147483647, %v1350_v33 }
  0x85   :  { %v1414_v25 = vadd.f32 1.0, %v1358_v31  ;;  %v1418_v2 = vsel %vm1332_vm1, %v213_v42, %v210_v5  ;;  %v237_v16 = vmul.f32 0.6931472, %v892_v57  ;;  %v284_v28 = vadd.f32 1.0, %v283_v62 }
  0x86   :  { %v292_v45 = vmul.f32 -0.5, %v1358_v31  ;;  %v894_v41 = vpop.eup %893  ;;  %v1423_v15 = vsel %vm1346_vm2, %v222_v51, %v219_v0  ;;  %v295_v32 = vand.u32 2147483647, %v1358_v31  ;;  %v1428_v37 = vadd.f32 1.0, %v1368_v30 }
  0x87   :  { %903 = vlog2.f32 %v1414_v25  ;;  %v1432_v5 = vsel %vm1361_vm3, %v231_v61, %v228_v24  ;;  %v246_v57 = vmul.f32 0.6931472, %v894_v41  ;;  %v276_v34 = vmul.f32 %v1342_v47, %v275_v59 }
  0x88   :  { %v293_v42 = vadd.f32 1.0, %v292_v45  ;;  %v896_v62 = vpop.eup %895  ;;  %vm1435_vm9 = vcmp.lt.f32.partialorder %v286_v18, 0.0004427343  ;;  %905 = vlog2.f32 %v1428_v37  ;;  %v301_v0 = vmul.f32 -0.5, %v1368_v30 }
  0x89   :  { %v304_v51 = vand.u32 2147483647, %v1368_v30  ;;  %v898_v52 = vpop.eup %897  ;;  %v1444_v61 = vsel %vm1370_vm4, %v240_v63, %v237_v16  ;;  %v255_v41 = vmul.f32 0.6931472, %v896_v62  ;;  %v285_v59 = vmul.f32 %v1350_v33, %v284_v28 }
  0x8a   :  { %v1448_v45 = vadd.f32 1.0, %v1377_v14  ;;  %v264_v55 = vmul.f32 0.6931472, %v898_v52  ;;  %vm1450_vm10 = vcmp.lt.f32.partialorder %v295_v32, 0.0004427343  ;;  %v302_v18 = vadd.f32 1.0, %v301_v0 }
  0x8b   :  { %v310_v47 = vmul.f32 -0.5, %v1377_v14  ;;  %v1457_v29 = vsel %vm1385_vm5, %v249_v40, %v246_v57  ;;  %v294_v63 = vmul.f32 %v1358_v31, %v293_v42  ;;  %v313_v16 = vand.u32 2147483647, %v1377_v14 }
  0x8c   :  { %v900_v13 = vpop.eup %899  ;;  %907 = vlog2.f32 %v1448_v45  ;;  %v1464_v52 = vsel %vm1397_vm6, %v258_v39, %v255_v41  ;;  %vm1466_vm11 = vcmp.lt.f32.partialorder %v304_v51, 0.0004427343  ;;  %v1472_v17 = vsel %vm1401_vm7, %v267_v49, %v264_v55 }
  0x8d   :  { %v273_v28 = vmul.f32 0.6931472, %v900_v13  ;;  %v311_v62 = vadd.f32 1.0, %v310_v47  ;;  %v902_v0 = vpop.eup %901  ;;  %v303_v40 = vmul.f32 %v1368_v30, %v302_v18  ;;  %909 = vrcp.f32 %v1296_v44 }
  0x8e   :  { %v1479_v39 = vsub.f32 %v1970_v60, %v1418_v2  ;;  %v282_v13 = vmul.f32 0.6931472, %v902_v0  ;;  %vm1481_vm12 = vcmp.lt.f32.partialorder %v313_v16, 0.0004427343  ;;  %911 = vrcp.f32 %v1303_v50 }
  0x8f   :  { %v1973_v49 = vmin.f32 %v1205_v4, 0.0  ;;  %v1493_v44 = vsel %vm1408_vm8, %v276_v34, %v273_v28  ;;  %v312_v35 = vmul.f32 %v1377_v14, %v311_v62  ;;  %913 = vrcp.f32 %v1313_v56 }
  0x90   :  { %v1974_v42 = vmin.f32 %v1209_v7, 0.0  ;;  %915 = vrcp.f32 %v1321_v6  ;;  %v1975_v50 = vmin.f32 %v1211_v9, 0.0  ;;  %v1976_v34 = vmin.f32 %v1213_v10, 0.0 }
  0x91   :  { %v1489_v47 = vsub.f32 %v1973_v49, %v1423_v15  ;;  %v904_v41 = vpop.eup %903  ;;  %v1977_v56 = vmin.f32 %v1215_v11, 0.0  ;;  %v1521_v6 = vsel %vm1435_vm9, %v285_v59, %v282_v13  ;;  %917 = vrcp.f32 %v1339_v12 }
  0x92   :  { %v1500_v51 = vsub.f32 %v1974_v42, %v1432_v5  ;;  %v1507_v1 = vsub.f32 %v1975_v50, %v1444_v61  ;;  %v1512_v55 = vsub.f32 %v1976_v34, %v1457_v29  ;;  %v291_v16 = vmul.f32 0.6931472, %v904_v41  ;;  %v906_v0 = vpop.eup %905 }
  0x93   :  { %v1517_v18 = vsub.f32 %v1977_v56, %v1464_v52  ;;  %v1978_v28 = vmin.f32 %v1226_v19, 0.0  ;;  %919 = vrcp.f32 %v1355_v36  ;;  %v1980_v54 = vmin.f32 %v1228_v20, 0.0 }
  0x94   :  { %v1982_v12 = vmin.f32 %v1231_v22, 0.0  ;;  %v421_v13 = vsub.f32 0.0, %v1233_v23  ;;  %v300_v49 = vmul.f32 0.6931472, %v906_v0  ;;  %921 = vrcp.f32 %v1366_v46 }
  0x95   :  { %v1528_v62 = vsub.f32 %v1978_v28, %v1472_v17  ;;  %v1535_v59 = vsub.f32 %v1980_v54, %v1493_v44  ;;  %vm355_vm1 = vcmp.ge.f32.partialorder %v1211_v9, 0.0  ;;  %v422_v36 = vsub.f32 0.0, %v1237_v26 }
  0x96   :  { %v1540_v60 = vsub.f32 %v1982_v12, %v1521_v6  ;;  %v423_v42 = vsub.f32 0.0, %v1239_v27  ;;  %v1549_v41 = vsel %vm1450_vm10, %v294_v63, %v291_v16  ;;  %923 = vrcp.f32 %v1383_v8  ;;  %v908_v28 = vpop.eup %907 }
  0x97   :  { %1979 = vst [vmem:[#allocation38_spill] sm:$0xff] %v1528_v62  ;;  %1981 = vst [vmem:[#allocation39_spill] sm:$0xff] %v1535_v59  ;;  %vm356_vm2 = vcmp.ge.f32.partialorder %v1213_v10, 0.0  ;;  %v1984_v50 = vsub.f32 0.0, %v1203_v3  ;;  %v1985_v46 = vsub.f32 0.0, %v1205_v4  ;;  %925 = vrcp.f32 %v1394_v21 }
  0x98   :  { %1983 = vst [vmem:[#allocation40_spill] sm:$0xff] %v1540_v60  ;;  %vm357_vm3 = vcmp.ge.f32.partialorder %v1215_v11, 0.0  ;;  %v1986_v24 = vmin.f32 %v1233_v23, 0.0  ;;  %v1988_v8 = vsub.f32 0.0, %v1209_v7  ;;  %v1989_v0 = vsub.f32 0.0, %v1211_v9 }
  0x99   :  { %v1555_v34 = vmin.f32 %v1984_v50, 0.0  ;;  %v1559_v56 = vmin.f32 %v1985_v46, 0.0  ;;  %v1578_v12 = vsel %vm1466_vm11, %v303_v40, %v300_v49  ;;  %v309_v21 = vmul.f32 0.6931472, %v908_v28 }
  0x9a   :  { %v1566_v63 = vsub.f32 %v1986_v24, %v1549_v41  ;;  %v1570_v16 = vmin.f32 %v1988_v8, 0.0  ;;  %v1574_v54 = vmin.f32 %v1989_v0, 0.0  ;;  %927 = vrcp.f32 %v1414_v25  ;;  %v910_v24 = vpop.eup %909 }
  0x9b   :  { %vm358_vm4 = vcmp.ge.f32.partialorder %v1226_v19, 0.0  ;;  %v1990_v50 = vsub.f32 0.0, %v1213_v10  ;;  %929 = vrcp.f32 %v1428_v37  ;;  %vm359_vm5 = vcmp.ge.f32.partialorder %v1228_v20, 0.0  ;;  %v912_v0 = vpop.eup %911 }
  0x9c   :  { %1987 = vst [vmem:[#allocation41_spill] sm:$0xff] %v1566_v63  ;;  %v1991_v8 = vmin.f32 %v1237_v26, 0.0  ;;  %v1993_v40 = vsub.f32 0.0, %v1215_v11  ;;  %v1994_v25 = vsub.f32 0.0, %v1226_v19  ;;  %931 = vrcp.f32 %v1448_v45  ;;  %v914_v60 = vpop.eup %913 }
  0x9d   :  { %v1584_v46 = vmin.f32 %v1990_v50, 0.0  ;;  %vm360_vm6 = vcmp.ge.f32.partialorder %v1231_v22, 0.0  ;;  %v364_v37 = vmul.f32 %v910_v24, %v1288_v38  ;;  %v1995_v50 = vsub.f32 0.0, %v1228_v20  ;;  %v916_v59 = vpop.eup %915 }
  0x9e   :  { %v1591_v32 = vsub.f32 %v1991_v8, %v1578_v12  ;;  %v1595_v49 = vmin.f32 %v1993_v40, 0.0  ;;  %v1599_v28 = vmin.f32 %v1994_v25, 0.0  ;;  %v1996_v8 = vsub.f32 0.0, %v1231_v22 }
  0x9f   :  { %v431_v63 = vmin.f32 %v1995_v50, 0.0  ;;  %v1610_v40 = vsel %vm1481_vm12, %v312_v35, %v309_v21  ;;  %vm361_vm7 = vcmp.ge.f32.partialorder %v1233_v23, 0.0  ;;  %vm362_vm8 = vcmp.ge.f32.partialorder %v1237_v26, 0.0 }
  0xa0   :  { %1992 = vst [vmem:[#allocation42_spill] sm:$0xff] %v1591_v32  ;;  %v432_v32 = vmin.f32 %v1996_v8, 0.0  ;;  %v365_v45 = vmul.f32 %v912_v0, %v1293_v43  ;;  %v1615_v25 = vmin.f32 %v421_v13, 0.0  ;;  %v1617_v38 = vmin.f32 %v422_v36, 0.0  ;;  %v918_v43 = vpop.eup %917 }
  0xa1   :  { %vm363_vm9 = vcmp.ge.f32.partialorder %v1239_v27, 0.0  ;;  %v366_v50 = vmul.f32 %v914_v60, %v1300_v48  ;;  %v1997_v57 = vmin.f32 %v1239_v27, 0.0  ;;  %v1626_v21 = vmin.f32 %v423_v42, 0.0 }
  0xa2   :  { %v436_v8 = vsub.f32 %v1555_v34, %v1418_v2  ;;  %v367_v13 = vmul.f32 %v916_v59, %v1307_v53  ;;  %v1633_v36 = vsel %vm352_vm13, %v910_v24, %v364_v37  ;;  %v437_v48 = vsub.f32 %v1559_v56, %v1423_v15  ;;  %v1999_v34 = vld [vmem:[#allocation35_spill] sm:$0xff]  ;;  %v2000_v56 = vld [vmem:[#allocation36_spill] sm:$0xff] }
  0xa3   :  { %v1624_v35 = vsub.f32 %v1997_v57, %v1610_v40  ;;  %v438_v62 = vsub.f32 %v1570_v16, %v1432_v5  ;;  %v920_v57 = vpop.eup %919  ;;  %v368_v42 = vmul.f32 %v918_v43, %v1315_v58  ;;  %v439_v53 = vsub.f32 %v1574_v54, %v1444_v61 }
  0xa4   :  { %v440_v3 = vsub.f32 %v1584_v46, %v1457_v29  ;;  %v922_v2 = vpop.eup %921  ;;  %v369_v24 = vmul.f32 %v920_v57, %v1999_v34  ;;  %v1651_v15 = vsel %vm354_vm15, %v914_v60, %v366_v50  ;;  %v441_v58 = vsub.f32 %v1595_v49, %v1464_v52  ;;  %v2001_v60 = vld [vmem:[#allocation37_spill] sm:$0xff] }
  0xa5   :  { %1998 = vst [vmem:[#allocation43_spill] sm:$0xff] %v1624_v35  ;;  %v1642_v35 = vsel %vm353_vm14, %v912_v0, %v365_v45  ;;  %v442_v4 = vsub.f32 %v1599_v28, %v1472_v17  ;;  %v924_v5 = vpop.eup %923  ;;  %v370_v16 = vmul.f32 %v922_v2, %v2000_v56  ;;  %v1660_v61 = vsel %vm355_vm1, %v916_v59, %v367_v13 }
  0xa6   :  { %v443_v29 = vsub.f32 %v431_v63, %v1493_v44  ;;  %v444_v54 = vsub.f32 %v432_v32, %v1521_v6  ;;  %v926_v7 = vpop.eup %925  ;;  %v371_v46 = vmul.f32 %v924_v5, %v2001_v60  ;;  %v1667_v52 = vsel %vm356_vm2, %v918_v43, %v368_v42 }
  0xa7   :  { %v445_v17 = vsub.f32 %v1615_v25, %v1549_v41  ;;  %v446_v49 = vsub.f32 %v1617_v38, %v1578_v12  ;;  %v928_v9 = vpop.eup %927  ;;  %v372_v59 = vmul.f32 %v926_v7, %v1350_v33  ;;  %v1676_v44 = vsel %vm357_vm3, %v920_v57, %v369_v24 }
  0xa8   :  { %v447_v6 = vsub.f32 %v1626_v21, %v1610_v40  ;;  %v1680_v63 = vmax.f32 %v436_v8, -18.420681  ;;  %v930_v10 = vpop.eup %929  ;;  %v373_v32 = vmul.f32 %v928_v9, %v1358_v31  ;;  %v1685_v41 = vsel %vm358_vm4, %v922_v2, %v370_v16 }
  0xa9   :  { %v1687_v12 = vmax.f32 %v437_v48, -18.420681  ;;  %v1689_v28 = vmax.f32 %v438_v62, -18.420681  ;;  %v932_v33 = vpop.eup %931  ;;  %v374_v11 = vmul.f32 %v930_v10, %v1368_v30  ;;  %v1694_v0 = vsel %vm359_vm5, %v924_v5, %v371_v46  ;;  %v2004_v46 = vld [vmem:[#allocation26_spill] sm:$0xff] }
  0xaa   :  { %v1696_v37 = vmax.f32 %v439_v53, -18.420681  ;;  %v1698_v40 = vmax.f32 %v440_v3, -18.420681  ;;  %v375_v31 = vmul.f32 %v932_v33, %v1377_v14  ;;  %v1703_v19 = vsel %vm360_vm6, %v926_v7, %v372_v59  ;;  %v2003_v7 = vld [vmem:[#allocation25_spill] sm:$0xff] }
  0xab   :  { %v1705_v45 = vmax.f32 %v441_v58, -18.420681  ;;  %v1707_v62 = vmax.f32 %v442_v4, -18.420681  ;;  %v1711_v30 = vsel %vm361_vm7, %v928_v9, %v373_v32  ;;  %v1715_v20 = vsel %vm362_vm8, %v930_v10, %v374_v11  ;;  %v2005_v11 = vld [vmem:[#allocation27_spill] sm:$0xff] }
  0xac   :  { %v1717_v25 = vmax.f32 %v443_v29, -18.420681  ;;  %v1719_v38 = vmax.f32 %v444_v54, -18.420681  ;;  %v1723_v22 = vsel %vm363_vm9, %v932_v33, %v375_v31  ;;  %v460_v14 = vsub.f32 1.0, %v1633_v36 }
  0xad   :  { %v461_v50 = vsub.f32 1.0, %v1642_v35  ;;  %v462_v23 = vsub.f32 1.0, %v1651_v15  ;;  %v463_v21 = vsub.f32 1.0, %v1660_v61  ;;  %v464_v26 = vsub.f32 1.0, %v1667_v52 }
  0xae   :  { %2002 = vst [vmem:[#allocation35_spill] sm:$0xff] %v1719_v38  ;;  %v465_v8 = vsub.f32 1.0, %v1676_v44  ;;  %v466_v43 = vsub.f32 1.0, %v1685_v41  ;;  %v467_v13 = vsub.f32 1.0, %v1694_v0  ;;  %v468_v27 = vsub.f32 1.0, %v1703_v19 }
  0xaf   :  { %v469_v48 = vsub.f32 1.0, %v1711_v30  ;;  %v470_v57 = vsub.f32 1.0, %v1715_v20  ;;  %v471_v42 = vsub.f32 1.0, %v1723_v22  ;;  %v472_v53 = vmul.f32 %v460_v14, %v460_v14  ;;  %v148_v14 = vld [vmem:[#allocation7] sm:$0xff] }
  0xb0   :  { %v473_v3 = vmul.f32 %v461_v50, %v461_v50  ;;  %v474_v2 = vmul.f32 %v462_v23, %v462_v23  ;;  %v475_v34 = vmul.f32 %v463_v21, %v463_v21  ;;  %v476_v24 = vmul.f32 %v464_v26, %v464_v26  ;;  %v149_v50 = vld [vmem:[#allocation7 + $0x8] sm:$0xff]  ;;  %v2007_v26 = vld [vmem:[#allocation28_spill] sm:$0xff] }
  0xb1   :  { %v477_v58 = vmul.f32 %v465_v8, %v465_v8  ;;  %v478_v4 = vmul.f32 %v466_v43, %v466_v43  ;;  %v479_v5 = vmul.f32 %v467_v13, %v467_v13  ;;  %v480_v56 = vmul.f32 %v468_v27, %v468_v27  ;;  %v150_v13 = vld [vmem:[#allocation7 + $0x10] sm:$0xff]  ;;  %v151_v27 = vld [vmem:[#allocation7 + $0x18] sm:$0xff] }
  0xb2   :  { %v481_v16 = vmul.f32 %v469_v48, %v469_v48  ;;  %v482_v29 = vmul.f32 %v470_v57, %v470_v57  ;;  %v483_v54 = vmul.f32 %v471_v42, %v471_v42  ;;  %v506_v60 = vmul.f32 %v2003_v7, %v472_v53  ;;  %v152_v48 = vld [vmem:[#allocation7 + $0x20] sm:$0x1f] }
  0xb3   :  { %v507_v9 = vmul.f32 %v2004_v46, %v473_v3  ;;  %v508_v59 = vmul.f32 %v2003_v7, %v474_v2  ;;  %v509_v10 = vmul.f32 %v2004_v46, %v475_v34  ;;  %v510_v32 = vmul.f32 %v2003_v7, %v476_v24  ;;  %v154_v3 = vld [vmem:[#allocation7 + $0x30] sm:$0xff]  ;;  %v155_v2 = vld [vmem:[#allocation7 + $0x38] sm:$0xff] }
  0xb4   :  { %v511_v33 = vmul.f32 %v2004_v46, %v477_v58  ;;  %v512_v31 = vmul.f32 %v2005_v11, %v478_v4  ;;  %v1744_v23 = vmax.f32 %v445_v17, -18.420681  ;;  %v1746_v21 = vmax.f32 %v446_v49, -18.420681  ;;  %v153_v49 = vld [vmem:[#allocation7 + $0x28] sm:$0x1f] }
  0xb5   :  { %v513_v8 = vmul.f32 %v2007_v26, %v479_v5  ;;  %v514_v43 = vmul.f32 %v2005_v11, %v480_v56  ;;  %v1750_v57 = vmax.f32 %v447_v6, -18.420681  ;;  %v1753_v42 = vmul.f32 %v2007_v26, %v481_v16  ;;  %v156_v4 = vld [vmem:[#allocation7 + $0x40] sm:$0xff]  ;;  %v157_v5 = vld [vmem:[#allocation7 + $0x48] sm:$0xff]  ;;  %v158_v56 = vld [vmem:[#allocation7 + $0x50] sm:$0x1f] }
  0xb6   :  { %2006 = vst [vmem:[#allocation36_spill] sm:$0xff] %v1744_v23  ;;  %v1756_v53 = vmul.f32 %v2005_v11, %v482_v29  ;;  %v1759_v17 = vmul.f32 %v2007_v26, %v483_v54  ;;  %v1762_v34 = vmul.f32 %v506_v60, %v1479_v39  ;;  %v1765_v24 = vmul.f32 %v507_v9, %v1489_v47  ;;  %v2008_v39 = vld [vmem:[#allocation38_spill] sm:$0xff]  ;;  %v2010_v47 = vld [vmem:[#allocation39_spill] sm:$0xff]  ;;  %v2012_v9 = vld [vmem:[#allocation40_spill] sm:$0xff] }
  0xb7   :  { %v1768_v6 = vmul.f32 %v508_v59, %v1500_v51  ;;  %v1771_v58 = vmul.f32 %v509_v10, %v1507_v1  ;;  %v1774_v16 = vmul.f32 %v510_v32, %v1512_v55  ;;  %v1777_v29 = vmul.f32 %v511_v33, %v1517_v18  ;;  %v159_v51 = vld [vmem:[#allocation7 + $0x58] sm:$0x1f] }
  0xb8   :  { %v1780_v54 = vmul.f32 %v512_v31, %v2008_v39  ;;  %v1783_v60 = vmul.f32 %v513_v8, %v2010_v47  ;;  %v1786_v59 = vmul.f32 %v514_v43, %v2012_v9  ;;  %v530_v1 = vsub.f32 1.0, %v148_v14 }
  0xb9   :  { %v531_v10 = vsub.f32 1.0, %v149_v50  ;;  %v532_v26 = vsub.f32 1.0, %v150_v13  ;;  %v533_v46 = vsub.f32 1.0, %v151_v27  ;;  %v534_v11 = vsub.f32 1.0, %v152_v48 }
  0xba   :  { %2009 = vst [vmem:[#allocation37_spill] sm:$0xff] %v1780_v54  ;;  %2011 = vst [vmem:[#allocation38_spill] sm:$0xff] %v1783_v60  ;;  %v535_v55 = vsub.f32 1.0, %v153_v49  ;;  %v536_v32 = vsub.f32 1.0, %v154_v3  ;;  %v537_v7 = vsub.f32 1.0, %v155_v2  ;;  %v538_v18 = vsub.f32 1.0, %v156_v4 }
  0xbb   :  { %v539_v33 = vsub.f32 1.0, %v157_v5  ;;  %v540_v23 = vsub.f32 1.0, %v158_v56  ;;  %v541_v31 = vsub.f32 1.0, %v159_v51  ;;  %v542_v39 = vmul.f32 %v530_v1, %v530_v1 }
  0xbc   :  { %v543_v54 = vmul.f32 %v531_v10, %v531_v10  ;;  %v544_v8 = vmul.f32 %v532_v26, %v532_v26  ;;  %v545_v47 = vmul.f32 %v533_v46, %v533_v46  ;;  %v546_v60 = vmul.f32 %v534_v11, %v534_v11  ;;  %v2013_v11 = vld [vmem:[#allocation29_spill] sm:$0xff] }
  0xbd   :  { %v547_v38 = vmul.f32 %v535_v55, %v535_v55  ;;  %v548_v43 = vmul.f32 %v536_v32, %v536_v32  ;;  %v549_v9 = vmul.f32 %v537_v7, %v537_v7  ;;  %v550_v14 = vmul.f32 %v538_v18, %v538_v18  ;;  %v2014_v32 = vld [vmem:[#allocation30_spill] sm:$0xff] }
  0xbe   :  { %v551_v50 = vmul.f32 %v539_v33, %v539_v33  ;;  %v552_v13 = vmul.f32 %v540_v23, %v540_v23  ;;  %v553_v27 = vmul.f32 %v541_v31, %v541_v31  ;;  %v554_v48 = vmul.f32 %v542_v39, %v542_v39  ;;  %v2016_v31 = vld [vmem:[#allocation32_spill] sm:$0xff] }
  0xbf   :  { %v555_v49 = vmul.f32 %v543_v54, %v543_v54  ;;  %v556_v3 = vmul.f32 %v544_v8, %v544_v8  ;;  %v557_v2 = vmul.f32 %v545_v47, %v545_v47  ;;  %v558_v4 = vmul.f32 %v546_v60, %v546_v60  ;;  %v2015_v60 = vld [vmem:[#allocation31_spill] sm:$0xff] }
  0xc0   :  { %v559_v5 = vmul.f32 %v547_v38, %v547_v38  ;;  %v560_v56 = vmul.f32 %v548_v43, %v548_v43  ;;  %v561_v51 = vmul.f32 %v549_v9, %v549_v9  ;;  %v562_v1 = vmul.f32 %v550_v14, %v550_v14 }
  0xc1   :  { %v563_v10 = vmul.f32 %v551_v50, %v551_v50  ;;  %v564_v26 = vmul.f32 %v552_v13, %v552_v13  ;;  %v565_v46 = vmul.f32 %v553_v27, %v553_v27  ;;  %v588_v55 = vmul.f32 %v2013_v11, %v554_v48 }
  0xc2   :  { %v589_v7 = vmul.f32 %v2014_v32, %v555_v49  ;;  %v590_v18 = vmul.f32 %v2013_v11, %v556_v3  ;;  %v591_v23 = vmul.f32 %v2014_v32, %v557_v2  ;;  %v592_v54 = vmul.f32 %v2013_v11, %v558_v4 }
  0xc3   :  { %v593_v33 = vmul.f32 %v2014_v32, %v559_v5  ;;  %v594_v38 = vmul.f32 %v2015_v60, %v560_v56  ;;  %v595_v39 = vmul.f32 %v2016_v31, %v561_v51  ;;  %v596_v8 = vmul.f32 %v2015_v60, %v562_v1 }
  0xc4   :  { %v597_v47 = vmul.f32 %v2016_v31, %v563_v10  ;;  %v598_v43 = vmul.f32 %v2015_v60, %v564_v26  ;;  %v599_v9 = vmul.f32 %v2016_v31, %v565_v46  ;;  %v600_v14 = vmul.f32 %v1633_v36, %v1633_v36 }
  0xc5   :  { %v601_v50 = vmul.f32 %v1642_v35, %v1642_v35  ;;  %v602_v13 = vmul.f32 %v1651_v15, %v1651_v15  ;;  %v603_v27 = vmul.f32 %v1660_v61, %v1660_v61  ;;  %v604_v48 = vmul.f32 %v1667_v52, %v1667_v52 }
  0xc6   :  { %v605_v49 = vmul.f32 %v1676_v44, %v1676_v44  ;;  %v606_v3 = vmul.f32 %v1685_v41, %v1685_v41  ;;  %v607_v36 = vmul.f32 %v1694_v0, %v1694_v0  ;;  %v608_v35 = vmul.f32 %v1703_v19, %v1703_v19 }
  0xc7   :  { %v609_v15 = vmul.f32 %v1711_v30, %v1711_v30  ;;  %v610_v61 = vmul.f32 %v1715_v20, %v1715_v20  ;;  %vm668_vm10 = vcmask 1044480   ;;  %v611_v52 = vmul.f32 %v1723_v22, %v1723_v22 }
  0xc8   :  { %v612_v44 = vmul.f32 %v600_v14, %v588_v55  ;;  %v613_v2 = vmul.f32 %v601_v50, %v589_v7  ;;  %v614_v4 = vmul.f32 %v602_v13, %v590_v18  ;;  %v615_v41 = vmul.f32 %v603_v27, %v591_v23  ;;  %v2017_v7 = vld [vmem:[#allocation42_spill] sm:$0xff]  ;;  %v2018_v23 = vld [vmem:[#allocation43_spill] sm:$0xff]  ;;  %v2026_v27 = vld [vmem:[#allocation25_spill] sm:$0xff] }
  0xc9   :  { %v616_v5 = vmul.f32 %v604_v48, %v592_v54  ;;  %v617_v56 = vmul.f32 %v605_v49, %v593_v33  ;;  %v618_v0 = vmul.f32 %v606_v3, %v594_v38  ;;  %v619_v51 = vmul.f32 %v607_v36, %v595_v39  ;;  %v2019_v33 = vld [vmem:[#allocation41_spill] sm:$0xff]  ;;  %v2027_v49 = vld [vmem:[#allocation27_spill] sm:$0xff] }
  0xca   :  { %v620_v1 = vmul.f32 %v608_v35, %v596_v8  ;;  %v621_v19 = vmul.f32 %v609_v15, %v597_v47  ;;  %v622_v10 = vmul.f32 %v610_v61, %v598_v43  ;;  %vm719_vm11 = vcmask 1043456   ;;  %v2024_v47 = vld [vmem:[#allocation33_spill] sm:$0xff]  ;;  %v2025_v43 = vld [vmem:[#allocation34_spill] sm:$0xff] }
  0xcb   :  { %v623_v30 = vmul.f32 %v611_v52, %v599_v9  ;;  %v624_v26 = vmul.f32 %v612_v44, %v1680_v63  ;;  %v625_v20 = vmul.f32 %v613_v2, %v1687_v12  ;;  %v626_v46 = vmul.f32 %v614_v4, %v1689_v28  ;;  %v2028_v52 = vld [vmem:[#allocation26_spill] sm:$0xff]  ;;  %v2029_v2 = vld [vmem:[#allocation28_spill] sm:$0xff] }
  0xcc   :  { %v627_v22 = vmul.f32 %v615_v41, %v1696_v37  ;;  %v628_v11 = vmul.f32 %v616_v5, %v1698_v40  ;;  %v629_v55 = vmul.f32 %v617_v56, %v1705_v45  ;;  %v630_v32 = vmul.f32 %v618_v0, %v1707_v62 }
  0xcd   :  { %v528_v18 = vmul.f32 %v1756_v53, %v2017_v7  ;;  %v529_v54 = vmul.f32 %v1759_v17, %v2018_v23  ;;  %v631_v63 = vmul.f32 %v619_v51, %v1717_v25  ;;  %v634_v12 = vmul.f32 %v622_v10, %v1746_v21  ;;  %v2020_v25 = vld [vmem:[#allocation35_spill] sm:$0xff]  ;;  %v2021_v21 = vld [vmem:[#allocation36_spill] sm:$0xff] }
  0xce   :  { %v635_v28 = vmul.f32 %v623_v30, %v1750_v57  ;;  %v636_v37 = vadd.f32 %v624_v26, %v1762_v34  ;;  %v637_v40 = vadd.f32 %v625_v20, %v1765_v24  ;;  %v638_v45 = vadd.f32 %v626_v46, %v1768_v6  ;;  %v2022_v57 = vld [vmem:[#allocation37_spill] sm:$0xff]  ;;  %v2023_v34 = vld [vmem:[#allocation38_spill] sm:$0xff] }
  0xcf   :  { %v527_v62 = vmul.f32 %v1753_v42, %v2019_v33  ;;  %v639_v53 = vadd.f32 %v627_v22, %v1771_v58  ;;  %v640_v60 = vadd.f32 %v628_v11, %v1774_v16  ;;  %v641_v17 = vadd.f32 %v629_v55, %v1777_v29 }
  0xd0   :  { %v632_v38 = vmul.f32 %v620_v1, %v2020_v25  ;;  %v633_v31 = vmul.f32 %v621_v19, %v2021_v21  ;;  %v642_v39 = vadd.f32 %v630_v32, %v2022_v57  ;;  %v643_v8 = vadd.f32 %v631_v63, %v2023_v34 }
  0xd1   :  { %v646_v24 = vadd.f32 %v634_v12, %v528_v18  ;;  %v654_v6 = vmul.f32 %v2024_v47, %v2024_v47  ;;  %v655_v42 = vmul.f32 %v2025_v43, %v2025_v43  ;;  %v667_v58 = vadd.f32 %v638_v45, %v636_v37  ;;  %v2030_v47 = vld [vmem:[#allocation22_spill] sm:$0xff] }
  0xd2   :  { %v647_v9 = vadd.f32 %v635_v28, %v529_v54  ;;  %v669_v16 = vsel %vm668_vm10, %v640_v60, 0.0  ;;  %v681_v29 = vadd.f32 %v639_v53, %v637_v40  ;;  %v682_v14 = vsel %vm668_vm10, %v641_v17, 0.0 }
  0xd3   :  { %v658_v50 = vcombine.high %v654_v6, %v654_v6  ;;  %v659_v13 = vcombine.high %v655_v42, %v655_v42  ;;  %v662_v48 = vmul.f32 %v654_v6, %v2026_v27  ;;  %v664_v3 = vmul.f32 %v655_v42, %v2027_v49 }
  0xd4   :  { %v644_v36 = vadd.f32 %v632_v38, %v1786_v59  ;;  %v645_v35 = vadd.f32 %v633_v31, %v527_v62  ;;  %v670_v15 = vadd.f32 %v669_v16, %v667_v58  ;;  %v683_v61 = vadd.f32 %v682_v14, %v681_v29  ;;  %v666_v14 = vld [vmem:[#allocation2] sm:$0x3] }
  0xd5   :  { %v663_v44 = vmul.f32 %v658_v50, %v2028_v52  ;;  %v665_v4 = vmul.f32 %v659_v13, %v2029_v2  ;;  %v720_v41 = vsel %vm719_vm11, %v662_v48, 0.0  ;;  %v673_v56 = vsel %vm668_vm10, %v646_v24, 0.0 }
  0xd6   :  { %v671_v5 = vadd.f32 %v670_v15, %v642_v39  ;;  %v684_v0 = vadd.f32 %v683_v61, %v643_v8  ;;  %v721_v51 = vsel %vm719_vm11, %v664_v3, 0.0  ;;  %v686_v1 = vsel %vm668_vm10, %v647_v9, 0.0  ;;  %v718_v9 = vld [vmem:[#allocation3] sm:$0x3]  ;;  %v2032_v3 = vld [vmem:[#allocation23_spill] sm:$0xff] }
  0xd7   :  { %v722_v19 = vadd.f32 %v721_v51, %v720_v41  ;;  %v729_v59 = vsel %vm719_vm11, %v663_v44, 0.0  ;;  %v730_v10 = vsel %vm719_vm11, %v665_v4, 0.0  ;;  %v1085_v28 = vmov 1966171168  }
  0xd8   :  { %v672_v30 = vadd.f32 %v671_v5, %v644_v36  ;;  %v685_v26 = vadd.f32 %v684_v0, %v645_v35  ;;  %v731_v20 = vadd.f32 %v730_v10, %v729_v59  ;;  %v698_v37 = vunpack.c.l.s4 %v1085_v28  ;;  %v2033_v35 = vld [vmem:[#allocation24_spill] sm:$0xff] }
  0xd9   :  { %v723_v46 = vrot.slane %v722_v19, 4  ;;  %vm773_vm12 = vcmask 1040384  }
  0xda   :  { %v674_v22 = vadd.f32 %v673_v56, %v672_v30  ;;  %v687_v11 = vadd.f32 %v686_v1, %v685_v26  ;;  %v732_v55 = vrot.slane %v731_v20, 4  ;;  %v699_v38 = vunpack.c.0.s8 %v698_v37 }
  0xdb   :  { %v724_v32 = vadd.f32 %v723_v46, %v722_v19 }
  0xdc   :  { %v675_v7 = vrot.slane %v674_v22, 4  ;;  %v688_v18 = vrot.slane %v687_v11, 4  ;;  %v733_v23 = vadd.f32 %v732_v55, %v731_v20  ;;  %v702_v6 = vsub.s32 %v699_v38, %v2030_v47 }
  0xdd   :  { %v725_v54 = vrot.slane %v724_v32, 2 }
  0xde   :  { %v676_v63 = vadd.f32 %v675_v7, %v674_v22  ;;  %v689_v12 = vadd.f32 %v688_v18, %v687_v11  ;;  %v734_v40 = vrot.slane %v733_v23, 2 }
  0xdf   :  { %v726_v45 = vadd.f32 %v725_v54, %v724_v32 }
  0xe0   :  { %v677_v33 = vrot.slane %v676_v63, 2  ;;  %v690_v62 = vrot.slane %v689_v12, 2  ;;  %v735_v53 = vadd.f32 %v734_v40, %v733_v23 }
  0xe1   :  { %v727_v60 = vrot.slane %v726_v45, 1 }
  0xe2   :  { %v678_v17 = vadd.f32 %v677_v33, %v676_v63  ;;  %v691_v25 = vadd.f32 %v690_v62, %v689_v12  ;;  %v736_v21 = vrot.slane %v735_v53, 1 }
  0xe3   :  { %v728_v31 = vadd.f32 %v727_v60, %v726_v45 }
  0xe4   :  { %v679_v57 = vrot.slane %v678_v17, 1  ;;  %v692_v39 = vrot.slane %v691_v25, 1  ;;  %v737_v34 = vadd.f32 %v736_v21, %v735_v53 }
  0xe6   :  { %v680_v8 = vadd.f32 %v679_v57, %v678_v17  ;;  %v693_v24 = vadd.f32 %v692_v39, %v691_v25  ;;  %v740_v43 = vcombine.low %v728_v31, %v737_v34 }
  0xe8   :  { %v696_v42 = vcombine.low %v680_v8, %v693_v24  ;;  %v747_v58 = vrot.slane %v740_v43, %v702_v6 }
  0xea   :  { %v703_v16 = vrot.slane %v696_v42, %v702_v6  ;;  %v754_v29 = vrot.slane %v747_v58, %v702_v6 }
  0xec   :  { %v710_v50 = vrot.slane %v703_v16, %v702_v6  ;;  %v756_v13 = vadd.f32 %v754_v29, %v718_v9 }
  0xee   :  { %v712_v27 = vadd.f32 %v710_v50, %v666_v14  ;;  %757 = vst.msk [vmem:[#allocation3] sm:$0x3] %vm1195_vm0, %v756_v13 }
  0xf0   :  { %717 = vst.msk [vmem:[#allocation2] sm:$0x3] %vm1195_vm0, %v712_v27 }
  0xf5   :  { %v788_v49 = vld [vmem:[#allocation3] sm:$0x3] }
  0xf6   :  { %v793_v36 = vrot.slane %v788_v49, %v2032_v3  ;;  %v797_v15 = vrot.slane %v788_v49, %v2033_v35 }
  0xf7   :  { %v761_v61 = vld [vmem:[#allocation2] sm:$0x3] }
  0xf8   :  { %v766_v52 = vrot.slane %v761_v61, %v2032_v3  ;;  %v770_v44 = vrot.slane %v761_v61, %v2033_v35  ;;  %v800_v41 = vsel %vm773_vm12, %v793_v36, 0.0  ;;  %v801_v5 = vsel %vm773_vm12, %v797_v15, 0.0 }
  0xf9   :  { %v802_v0 = vadd.f32 %v801_v5, %v800_v41 }
  0xfa   :  { %v774_v2 = vsel %vm773_vm12, %v766_v52, 0.0  ;;  %v775_v4 = vsel %vm773_vm12, %v770_v44, 0.0 }
  0xfb   :  { %v776_v56 = vadd.f32 %v775_v4, %v774_v2 }
  0xfd   :  { %777 = vadd.xlane.f32.xlu0 %v776_v56 }
 0x101   :  { %803 = vadd.xlane.f32.xlu0 %v802_v0 }
 0x18a   :  { %v778_v51 = vpop.xlane.xlu0 %777 }
 0x18b   :  { %v779_v1 = vrot.slane %v778_v51, 4 }
 0x18d   :  { %v780_v19 = vadd.f32 %v779_v1, %v778_v51 }
 0x18e   :  { %v804_v59 = vpop.xlane.xlu0 %803 }
 0x18f   :  { %v781_v10 = vrot.slane %v780_v19, 2  ;;  %v805_v30 = vrot.slane %v804_v59, 4 }
 0x191   :  { %v806_v26 = vadd.f32 %v805_v30, %v804_v59  ;;  %v782_v20 = vadd.f32 %v781_v10, %v780_v19 }
 0x193   :  { %v807_v46 = vrot.slane %v806_v26, 2  ;;  %v783_v22 = vrot.slane %v782_v20, 1 }
 0x195   :  { %v808_v11 = vadd.f32 %v807_v46, %v806_v26  ;;  %v784_v55 = vadd.f32 %v783_v22, %v782_v20 }
 0x197   :  { %842 = vpush %v784_v55  ;;  %v809_v32 = vrot.slane %v808_v11, 1 }
 0x199   :  { %v810_v7 = vadd.f32 %v809_v32, %v808_v11 }
 0x19b   :  { %844 = vpush %v810_v7 }
 0x1c8   :  { %s843_s4 = spop %842 }
 0x1c9   :  { %787 = sst [smem:[#allocation13]] %s843_s4 }
 0x1ca   :  { %1052 = shalt.err (!%p1049_p0)
}
 0x1cb   :  { %s1086_s18 = smov [#allocation13]   ;;  %s1053_s26 = scalar_lea.hbm %s1906_s6, 16 }
 0x1cc   :  { %821 = dma.smem_to_hbm %s1086_s18, 16, %s1905_s5, [#allocation6]  }
 0x1cd   :  { %s845_s22 = spop %844  ;;  %p1054_p1 = scmp.ne.s32.totalorder %s1906_s6, %s1053_s26 }
 0x1ce   :  { %813 = sst [smem:[#allocation14]] %s845_s22  ;;  %p1057_p2 = scmp.lt.u32.totalorder %s1053_s26, %s1906_s6 }
 0x1d0   :  { %p1059_p3 = pnand %p1057_p2, %p1054_p1 }
 0x1d2   :  { %1062 = shalt.err (!%p1059_p3)
}
 0x1d3   :  { %s1087_s29 = smov [#allocation14]  }
 0x1d4   :  { %829 = dma.smem_to_hbm %s1087_s29, 16, %s1906_s6, [#allocation15]  }
 0x1d5   :  { %1069 = dma.done.wait [#allocation6], 16  }
 0x1d6   :  { %1070 = vsyncadd [#allocation6], 4294967280 }
 0x1d7   :  { %1071 = dma.done.wait [#allocation15], 16  }
 0x1d8   :  { %1072 = vsyncadd [#allocation15], 4294967280 }
 0x1d9   :  { %836 = sfence }
 0x1da   :  { %837 = vsyncpa [#allocation5], 1 }
 0x1db   :  { %838 = vsyncpa [#allocation8], 1 }
 0x1dc   :  { %839 = vsyncpa [#allocation11], 1 }
 0x1dd   :  { %840 = vsyncpa [#allocation6], 1 }
 0x1de   :  { %841 = vsyncpa [#allocation15], 1 }

</bundles_post_ra>
